<compile_context>
chip_gen: v7x
topology: tpu7x:2x2x1
jax: 0.10.0
libtpu: 0.0.40
codegen_flags: <defaults>
</compile_context>

<pallas_src>
import math
from dataclasses import dataclass

import numpy as np
import jax
import jax.numpy as jnp
from jax.experimental import pallas as pl
from jax.experimental.pallas import tpu as pltpu


# ----------------------------- config ---------------------------------------
@dataclass
class TaskConfig:
    sampling_rate: int = 16000
    n_fft: int = 16
    win_size: int = 16
    hop_size: int = 4
    fmin: float = 0.0
    fmax: float = 8000.0
    num_mels: int = 8
    power: float = 1.0


def _round_up(x: int, m: int) -> int:
    return ((x + m - 1) // m) * m


# ----------------------- librosa-style mel filterbank -----------------------
def _hz_to_mel(freq):
    freq = np.asarray(freq, dtype=np.float64)
    f_sp = 200.0 / 3
    mels = freq / f_sp
    min_log_hz = 1000.0
    min_log_mel = min_log_hz / f_sp
    logstep = math.log(6.4) / 27.0
    return np.where(freq >= min_log_hz,
                    min_log_mel + np.log(np.maximum(freq, 1e-10) / min_log_hz) / logstep,
                    mels)


def _mel_to_hz(mels):
    mels = np.asarray(mels, dtype=np.float64)
    f_sp = 200.0 / 3
    freqs = f_sp * mels
    min_log_hz = 1000.0
    min_log_mel = min_log_hz / f_sp
    logstep = math.log(6.4) / 27.0
    return np.where(mels >= min_log_mel,
                    min_log_hz * np.exp(logstep * (mels - min_log_mel)),
                    freqs)


def librosa_mel_filterbank(sr, n_fft, n_mels, fmin, fmax):
    """Slaney-normalized mel filterbank, shape [n_mels, n_fft//2+1] (librosa default)."""
    n_freq = n_fft // 2 + 1
    fftfreqs = np.linspace(0.0, sr / 2.0, n_freq)
    mel_pts = np.linspace(_hz_to_mel(fmin), _hz_to_mel(fmax), n_mels + 2)
    mel_f = _mel_to_hz(mel_pts)
    fdiff = np.diff(mel_f)
    ramps = mel_f[:, None] - fftfreqs[None, :]
    lower = -ramps[:-2] / fdiff[:-1, None]
    upper = ramps[2:] / fdiff[1:, None]
    weights = np.maximum(0.0, np.minimum(lower, upper))
    enorm = 2.0 / (mel_f[2:n_mels + 2] - mel_f[:n_mels])
    weights *= enorm[:, None]
    return weights.astype(np.float32)


# ------------------------------ Pallas kernel --------------------------------
def _make_mel_kernel(power: float, n_freq_pad: int):
    """Kernel over a lane-dense tile of frames.

    frames_ref: [n_fft, tile]        bf16   (lane dim = B*T' frames)
    w_ref:      [2*n_freq_pad, n_fft] bf16  (fused windowed cos | sin DFT basis)
    fb_ref:     [n_mels, n_freq_pad]  f32
    out_ref:    [n_mels, tile]        f32
    """
    def mel_kernel(frames_ref, w_ref, fb_ref, out_ref):
        # One fused MXU matmul gives both real and imaginary parts.
        r = jnp.dot(w_ref[...], frames_ref[...],
                    preferred_element_type=jnp.float32)       # [2*NP, tile]
        re = r[:n_freq_pad, :]                                 # sublane-aligned slices
        im = r[n_freq_pad:, :]
        mag2 = re * re + im * im                               # |X|^2 (f32, lane-dense)
        if power == 2.0:
            spec = mag2
        elif power == 1.0:
            spec = jnp.sqrt(mag2)
        else:
            spec = jnp.power(mag2, power * 0.5)
        mel = jnp.dot(fb_ref[...], spec,
                      preferred_element_type=jnp.float32)      # [n_mels, tile]
        out_ref[...] = jnp.log(jnp.maximum(mel, 1e-5))
    return mel_kernel


# ------------------------------ wrapper --------------------------------------
class MelSpectrogramPallas:
    MAX_TILE = 1024   # lane-tile of frames; fits comfortably in scoped VMEM on v5e/v6e/v7x

    def __init__(self, config: TaskConfig, for_loss: bool = False):
        self.config = config
        n_fft, win, sr = config.n_fft, config.win_size, config.sampling_rate
        n_freq = n_fft // 2 + 1
        n_freq_pad = _round_up(n_freq, 8)   # sublane-aligned split point for re/im

        # Hann window (periodic, as in torch.hann_window), centered-padded to n_fft.
        n = np.arange(win, dtype=np.float64)
        hann = 0.5 - 0.5 * np.cos(2.0 * np.pi * n / win)
        pad_left = (n_fft - win) // 2
        window = np.zeros(n_fft, dtype=np.float64)
        window[pad_left:pad_left + win] = hann

        # Fused windowed real-DFT basis, transposed layout:
        #   rows [0, n_freq)                  -> w[n] * cos(2*pi*n*k/n_fft)
        #   rows [n_freq_pad, n_freq_pad+n_freq) -> w[n] * sin(2*pi*n*k/n_fft)
        nn = np.arange(n_fft, dtype=np.float64)[:, None]
        kk = np.arange(n_freq, dtype=np.float64)[None, :]
        ang = 2.0 * np.pi * nn * kk / n_fft
        wcos_t = (window[:, None] * np.cos(ang)).T             # [n_freq, n_fft]
        wsin_t = (window[:, None] * np.sin(ang)).T
        w_fused = np.zeros((2 * n_freq_pad, n_fft), dtype=np.float32)
        w_fused[:n_freq] = wcos_t
        w_fused[n_freq_pad:n_freq_pad + n_freq] = wsin_t
        self.w = jnp.asarray(w_fused, dtype=jnp.bfloat16)

        # Mel filterbank [n_mels, n_freq], zero-padded to [n_mels, n_freq_pad] (f32).
        fmax = None if for_loss else config.fmax
        fmax = sr / 2.0 if fmax is None else fmax
        fb = librosa_mel_filterbank(sr, n_fft, config.num_mels, config.fmin, fmax)
        fb_pad = np.zeros((config.num_mels, n_freq_pad), dtype=np.float32)
        fb_pad[:, :n_freq] = fb
        self.fb = jnp.asarray(fb_pad)

        self.pad = int((config.n_fft - config.hop_size) / 2)
        self.n_freq_pad = n_freq_pad
        self._kernel = _make_mel_kernel(config.power, n_freq_pad)

    # Gather-free frame construction: hop-decimate the padded audio, then the n_fft
    # frame rows are just shifted slices of the decimated matrix.
    def _frames_T(self, padded: jnp.ndarray, num_frames: int) -> jnp.ndarray:
        cfg = self.config
        n_fft, hop = cfg.n_fft, cfg.hop_size
        B, T_pad = padded.shape
        if n_fft % hop == 0:
            q_steps = n_fft // hop
            cols = num_frames + q_steps - 1
            need = cols * hop
            if need > T_pad:
                padded = jnp.pad(padded, ((0, 0), (0, need - T_pad)))
            # dec[b, r, c] = padded[b, c*hop + r]
            dec = padded[:, :need].reshape(B, cols, hop).transpose(0, 2, 1)  # [B, hop, cols]
            # frame_T[q*hop + r, b, t] = padded[b, t*hop + q*hop + r] = dec[b, r, t + q]
            parts = [dec[:, :, q:q + num_frames] for q in range(q_steps)]    # [B, hop, T']
            frames = jnp.stack(parts, axis=0)                                # [Q, B, hop, T']
            frames = frames.transpose(0, 2, 1, 3).reshape(n_fft, B * num_frames)
        else:
            # Fallback (general hop): explicit gather.
            idx = jnp.arange(num_frames)[:, None] * hop + jnp.arange(n_fft)[None, :]
            frames = padded[:, idx].transpose(2, 0, 1).reshape(n_fft, B * num_frames)
        return frames.astype(jnp.bfloat16)

    def __call__(self, audio: jnp.ndarray) -> jnp.ndarray:
        """audio: [B, T] float -> log-mel [B, n_mels, T']"""
        cfg = self.config
        n_fft, hop, n_mels = cfg.n_fft, cfg.hop_size, cfg.num_mels
        n_freq_pad = self.n_freq_pad

        # Glue (plain JAX): reflect pad + gather-free framing into [n_fft, B*T'] (bf16).
        padded = jnp.pad(audio.astype(jnp.float32),
                         ((0, 0), (self.pad, self.pad)), mode="reflect")
        B, T_pad = padded.shape
        num_frames = 1 + (T_pad - n_fft) // hop
        frames_T = self._frames_T(padded, num_frames)          # [n_fft, rows]

        rows = B * num_frames
        tile = min(self.MAX_TILE, _round_up(rows, 128))        # lane-dense tile of frames
        rows_padded = _round_up(rows, tile)
        if rows_padded > rows:                                  # zero-pad extra frame columns
            frames_T = jnp.pad(frames_T, ((0, 0), (0, rows_padded - rows)))
        grid = (rows_padded // tile,)

        out = pl.pallas_call(
            self._kernel,
            out_shape=jax.ShapeDtypeStruct((n_mels, rows_padded), jnp.float32),
            grid=grid,
            in_specs=[
                pl.BlockSpec((n_fft, tile), lambda i: (0, i)),
                pl.BlockSpec((2 * n_freq_pad, n_fft), lambda i: (0, 0)),
                pl.BlockSpec((n_mels, n_freq_pad), lambda i: (0, 0)),
            ],
            out_specs=pl.BlockSpec((n_mels, tile), lambda i: (0, i)),
            compiler_params=pltpu.CompilerParams(dimension_semantics=("parallel",)),
        )(frames_T, self.w, self.fb)

        # [n_mels, B*T'] -> [B, n_mels, T'] (drop padded frame columns first).
        out = out[:, :rows]
        return out.reshape(n_mels, B, num_frames).transpose(1, 0, 2)


# ------------------------------- main ----------------------------------------
if __name__ == "__main__":
    cfg = TaskConfig()
    mel_module = MelSpectrogramPallas(cfg)

    key = jax.random.PRNGKey(0)
    B, T = 2, 64
    audio = jax.random.normal(key, (B, T), dtype=jnp.float32)

    out = mel_module(audio)
    out = jax.block_until_ready(out)

    expected_frames = 1 + (T + 2 * mel_module.pad - cfg.n_fft) // cfg.hop_size
    assert out.shape == (B, cfg.num_mels, expected_frames), out.shape
    assert out.dtype == jnp.float32
    assert bool(jnp.all(jnp.isfinite(out)))
    print("KERNEL_OK")
</pallas_src>

<mosaic_0001>
module attributes {stable_mosaic.version = 11 : i64} {
  func.func @mel_kernel(%arg0: i32, %arg1: memref<16x128xbf16, #tpu.memory_space<vmem>>, %arg2: memref<32x16xbf16, #tpu.memory_space<vmem>>, %arg3: memref<8x16xf32, #tpu.memory_space<vmem>>, %arg4: memref<8x128xf32, #tpu.memory_space<vmem>>) attributes {dimension_semantics = [#tpu.dimension_semantics<parallel>], iteration_bounds = array<i64: 1>, scalar_prefetch = 0 : i64, scratch_operands = 0 : i64, tpu.core_type = #tpu.core_type<tc>, window_params = [{transform_indices = @transform_0, window_bounds = array<i64: 16, 128>}, {pipeline_mode = #tpu.pipeline_mode<synchronous>, transform_indices = @transform_1, window_bounds = array<i64: 32, 16>}, {pipeline_mode = #tpu.pipeline_mode<synchronous>, transform_indices = @transform_2, window_bounds = array<i64: 8, 16>}, {transform_indices = @transform_3, window_bounds = array<i64: 8, 128>}]} {
    %c0 = arith.constant 0 : index
    %c0_0 = arith.constant 0 : index
    %0 = vector.load %arg2[%c0, %c0_0] : memref<32x16xbf16, #tpu.memory_space<vmem>>, vector<32x16xbf16>
    %c0_1 = arith.constant 0 : index
    %c0_2 = arith.constant 0 : index
    %1 = vector.load %arg1[%c0_1, %c0_2] : memref<16x128xbf16, #tpu.memory_space<vmem>>, vector<16x128xbf16>
    %cst = arith.constant dense<0.000000e+00> : vector<32x128xf32>
    %2 = tpu.matmul %0, %1, %cst {dimension_numbers = #tpu.dot_dimension_numbers<[1], [0], [0], [1], [0, 0, 1, 1], [], []>} : vector<32x16xbf16>, vector<16x128xbf16>, vector<32x128xf32> -> vector<32x128xf32>
    %3 = vector.extract_strided_slice %2 {offsets = [0, 0], sizes = [16, 128], strides = [1, 1]} : vector<32x128xf32> to vector<16x128xf32>
    %4 = vector.extract_strided_slice %2 {offsets = [16, 0], sizes = [16, 128], strides = [1, 1]} : vector<32x128xf32> to vector<16x128xf32>
    %5 = arith.mulf %3, %3 : vector<16x128xf32>
    %6 = arith.mulf %4, %4 : vector<16x128xf32>
    %7 = arith.addf %5, %6 : vector<16x128xf32>
    %8 = math.sqrt %7 : vector<16x128xf32>
    %c0_3 = arith.constant 0 : index
    %c0_4 = arith.constant 0 : index
    %9 = vector.load %arg3[%c0_3, %c0_4] : memref<8x16xf32, #tpu.memory_space<vmem>>, vector<8x16xf32>
    %cst_5 = arith.constant dense<0.000000e+00> : vector<8x128xf32>
    %10 = tpu.matmul %9, %8, %cst_5 {dimension_numbers = #tpu.dot_dimension_numbers<[1], [0], [0], [1], [0, 0, 1, 1], [], []>} : vector<8x16xf32>, vector<16x128xf32>, vector<8x128xf32> -> vector<8x128xf32>
    %cst_6 = arith.constant 9.99999974E-6 : f32
    %11 = vector.broadcast %cst_6 : f32 to vector<8x128xf32>
    %12 = arith.maximumf %10, %11 : vector<8x128xf32>
    %13 = math.log %12 : vector<8x128xf32>
    %c0_7 = arith.constant 0 : index
    %c0_8 = arith.constant 0 : index
    %14 = vector.load %arg4[%c0_7, %c0_8] : memref<8x128xf32, #tpu.memory_space<vmem>>, vector<8x128xf32>
    tpu.vector_store %arg4[%c0_7, %c0_8], %13 {strides = array<i32>} : memref<8x128xf32, #tpu.memory_space<vmem>>, vector<8x128xf32>,
    return
  }
  func.func @transform_0(%arg0: i32) -> (i32, i32) {
    %c0_i32 = arith.constant 0 : i32
    %c0_i32_0 = arith.constant 0 : i32
    return %c0_i32, %arg0 : i32, i32
  }
  func.func @transform_1(%arg0: i32) -> (i32, i32) {
    %c0_i32 = arith.constant 0 : i32
    %c0_i32_0 = arith.constant 0 : i32
    %c0_i32_1 = arith.constant 0 : i32
    return %c0_i32, %c0_i32_0 : i32, i32
  }
  func.func @transform_2(%arg0: i32) -> (i32, i32) {
    %c0_i32 = arith.constant 0 : i32
    %c0_i32_0 = arith.constant 0 : i32
    %c0_i32_1 = arith.constant 0 : i32
    return %c0_i32, %c0_i32_0 : i32, i32
  }
  func.func @transform_3(%arg0: i32) -> (i32, i32) {
    %c0_i32 = arith.constant 0 : i32
    %c0_i32_0 = arith.constant 0 : i32
    return %c0_i32, %arg0 : i32, i32
  }
}

</mosaic_0001>

<bundles_post_ra>
// kernel: tpu_custom_call.1
= control target key start
LH: loop header
LB: loop body
LE: loop exit
PB: predicated region body
PF: predicated region fallthrough
CT: control target
= control target key end

     0   :  { %vm38_vm0 = vcmask 130048   ;;  %s322_s0 = inlined_call_operand.vmem [shape: bf16[16,128], index: 0, kind: input, shape index: {}]   ;;  %s323_s1 = inlined_call_operand.vmem [shape: bf16[32,16], index: 1, kind: input, shape index: {}]   ;;  %s324_s2 = inlined_call_operand.vmem [shape: f32[8,16], index: 2, kind: input, shape index: {}]   ;;  %s325_s3 = inlined_call_operand.hbm [shape: f32[8,128], index: 3, kind: output, shape index: {}]  }
   0x1   :  { %v238_v0 = vld [vmem:[%s322_s0] sm:$0xff]   ;;  %v240_v2 = vld [vmem:[%s323_s1 + $0x8] sm:$0xff]  }
   0x2   :  { %v239_v1 = vld [vmem:[%s323_s1] sm:$0xff]   ;;  %218 = vmatprep.subr.bf16.mxu0 %v238_v0 }
   0x3   :  { %219 = vmatpush3.bf16.msra.mxu0 %v238_v0  ;;  %220 = vmatprep.mubr.msk.bf16.mxu0 %vm38_vm0, %v239_v1 }
   0x4   :  { %8 = vsyncpa [#allocation3], 0  ;;  %v271_v3 = vmov 0.0|0.0   ;;  %vm272_vm1 = vmmov 0   ;;  %v273_v4 = vmov 0.0   ;;  %v114_v26 = vld [vmem:[%s324_s2] sm:$0xff] }
   0x5   :  { %231 = vmatprep.subr.bf16.mxu1 %v271_v3  ;;  %228 = vmatprep.mubr.msk.f32.mxu1 %vm272_vm1, %v273_v4  ;;  %s274_s18 = smov [#allocation2]  }
   0x6   :  { %221 = vmatmul.mubr.msk.bf16.vlgmr.msra.gmra.mrb[0].mxu0 %vm38_vm0, %v240_v2  ;;  %s198_s19 = sshll.u32 %s274_s18, 4  ;;  %s199_s19 = int_to_ptr.vmem [resolvable:$true] %s198_s19 }
   0x7   :  { %s247_s20 = scalar_lea.vmem %s199_s19, 128  ;;  %p252_p1 = scmp.lt.s32.totalorder %s199_s19, %s199_s19 }
   0x8   :  { %p248_p0 = scmp.ne.s32.totalorder %s199_s19, %s247_s20  ;;  %p253_p2 = scmp.lt.s32.totalorder %s247_s20, %s247_s20 }
   0xa   :  { %p254_p3 = por %p253_p2, %p252_p1 }
   0xc   :  { %p255_p4 = pnand %p254_p3, %p248_p0 }
  0xd9   :  { %v222_v5 = vpop.f32.mrb[0].mxu0 }
  0xda   :  { %v96_v6 = vmul.f32 %v222_v5, %v222_v5  ;;  %v79_v7 = vpop.f32.mrb[1].mxu0 }
  0xdb   :  { %v94_v8 = vmul.f32 %v79_v7, %v79_v7  ;;  %v223_v9 = vpop.f32.mrb[2].mxu0 }
  0xdc   :  { %v97_v10 = vmul.f32 %v223_v9, %v223_v9  ;;  %v82_v11 = vpop.f32.mrb[3].mxu0 }
  0xdd   :  { %v98_v12 = vadd.f32 %v96_v6, %v94_v8  ;;  %v95_v13 = vmul.f32 %v82_v11, %v82_v11 }
  0xdf   :  { %v99_v14 = vadd.f32 %v97_v10, %v95_v13  ;;  %241 = vrsqrt.f32 %v98_v12  ;;  %vm102_vm2 = vcmp.eq.f32.partialorder %v98_v12, inf  ;;  %v105_v20 = vand.u32 2147483648, %v98_v12 }
  0xe0   :  { %vm104_vm4 = vcmp.eq.f32.partialorder %v98_v12, 0.0 }
  0xe1   :  { %243 = vrsqrt.f32 %v99_v14  ;;  %vm109_vm3 = vcmp.eq.f32.partialorder %v99_v14, inf  ;;  %v112_v21 = vand.u32 2147483648, %v99_v14  ;;  %vm111_vm5 = vcmp.eq.f32.partialorder %v99_v14, 0.0 }
  0xe9   :  { %v242_v15 = vpop.eup %241 }
  0xea   :  { %v101_v16 = vmul.f32 %v242_v15, %v98_v12 }
  0xeb   :  { %v244_v17 = vpop.eup %243 }
  0xec   :  { %v103_v18 = vsel %vm102_vm2, %v98_v12, %v101_v16  ;;  %v108_v19 = vmul.f32 %v244_v17, %v99_v14 }
  0xed   :  { %v106_v23 = vsel %vm104_vm4, %v105_v20, %v103_v18 }
  0xee   :  { %v110_v22 = vsel %vm109_vm3, %v99_v14, %v108_v19 }
  0xef   :  { %v113_v24 = vsel %vm111_vm5, %v112_v21, %v110_v22 }
  0xf0   :  { %v232_v25 = vpack.c.bf16 %v113_v24, %v106_v23 }
  0xf2   :  { %233 = vmatpush3.bf16.msra.mxu1 %v232_v25 }
  0xf5   :  { %229 = vmatmul.mubr.msk.f32.vlgmr.msra.gmra.mrb[0].mxu1 %vm38_vm0, %v114_v26 }
 0x1c8   :  { %v184_v27 = vpop.f32.mrb[0].mxu1 }
 0x1c9   :  { %v188_v28 = vmax.f32 %v184_v27, 1e-05  ;;  %v230_v29 = vpop.f32.mrb[1].mxu1 }
 0x1cb   :  { %245 = vlog2.f32 %v188_v28 }
 0x1d5   :  { %v246_v30 = vpop.eup %245 }
 0x1d6   :  { %v190_v31 = vmul.f32 0.6931472, %v246_v30 }
 0x1d8   :  { %191 = vst [vmem:[#allocation2] sm:$0xff] %v190_v31 }
 0x1d9   :  { %258 = shalt.err (!%p255_p4)
}
 0x1da   :  { %s259_s22 = scalar_lea.hbm %s325_s3, 128 }
 0x1db   :  { %p260_p5 = scmp.ne.s32.totalorder %s325_s3, %s259_s22  ;;  %p263_p6 = scmp.lt.u32.totalorder %s259_s22, %s325_s3 }
 0x1dd   :  { %p265_p7 = pnand %p263_p6, %p260_p5 }
 0x1df   :  { %268 = shalt.err (!%p265_p7)
}
 0x1e0   :  { %201 = dma.vmem_to_hbm [thread:$0]  %s199_s19, 128, %s325_s3, [#allocation3]  }
 0x1e1   :  { %269 = dma.done.wait [#allocation3], 128  }
 0x1e2   :  { %270 = vsyncadd [#allocation3], 4294967168 }
 0x1e3   :  { %205 = vsyncpa [#allocation3], 1 }

</bundles_post_ra>
